<compile_context>
chip_gen: v6e
topology: v6e:2x2x1
jax: 0.10.0
libtpu: 0.0.40
codegen_flags: <defaults>
</compile_context>

<pallas_src>
import functools

import jax
import jax.numpy as jnp
from jax.experimental import pallas as pl
from jax.experimental.pallas import tpu as pltpu

_GUARD = 128  # lane-aligned guard so the bulk x -> scratch store is unshifted


def highway_kernel(*refs, K, pad, NB, nL, l_axis, b_axis, has_halo, halo_full):
    # refs: x_ref (NB,C,TL), [halo_ref (rows,C,2*pad)], w_ref (K,2C,C), b_ref (2C,1),
    #       o_ref (NB,C,TL), xpad_ref scratch (NB,C,TL+2*GUARD)
    if has_halo:
        x_ref, halo_ref, w_ref, b_ref, o_ref, xpad_ref = refs
    else:
        x_ref, w_ref, b_ref, o_ref, xpad_ref = refs
        halo_ref = None

    C, TL = x_ref.shape[1], x_ref.shape[2]
    G = _GUARD
    li = pl.program_id(l_axis)
    bi = pl.program_id(b_axis)

    for b in range(NB):  # NB is a small static constant (unrolled)
        x = x_ref[b]                                   # (C, TL), compute dtype
        # Build the padded tile [left halo | x | right halo] ONCE in VMEM scratch.
        # x is stored at a 128-aligned lane offset -> unmasked, unshifted store.
        xpad_ref[b, :, G:G + TL] = x
        if has_halo:
            row = ((bi * NB + b) * nL + li) if halo_full else (b * nL + li)
            halo = halo_ref[row]                       # (C, 2*pad) resident VMEM read
            xpad_ref[b, :, G - pad:G] = halo[:, :pad]
            xpad_ref[b, :, G + TL:G + TL + pad] = halo[:, pad:]
        else:
            zpad = jnp.zeros((C, pad), dtype=xpad_ref.dtype)
            xpad_ref[b, :, G - pad:G] = zpad
            xpad_ref[b, :, G + TL:G + TL + pad] = zpad

        # K accumulating MXU matmuls over static lane-slices of the padded tile
        # (no im2col materialization).  Center tap reuses the already-loaded x.
        y = jnp.dot(w_ref[pad], x, preferred_element_type=jnp.float32)   # (2C, TL) f32
        for k in range(K):
            if k == pad:
                continue
            s = G - pad + k
            y = y + jnp.dot(w_ref[k], xpad_ref[b, :, s:s + TL],
                            preferred_element_type=jnp.float32)
        y = y + b_ref[...]                             # bias in the f32 epilogue

        # Note: if C is not a multiple of 8 the sublane splits below are masked but
        # still correct (slightly slower layouts).
        h1 = jax.nn.sigmoid(y[:C, :])                  # gate
        h2 = jnp.maximum(y[C:, :], 0.0)                # relu branch
        # Highway combine; dropout p=0.0 is the identity.
        # TODO(synk): dropout with p>0 (training mode) not implemented.
        o_ref[b] = (h1 * h2 + (1.0 - h1) * x.astype(jnp.float32)).astype(o_ref.dtype)


def _vmem_capacity_bytes():
    try:
        info = pltpu.get_tpu_info()
        cap = getattr(info, "vmem_capacity_bytes", None)
        if cap:
            return int(cap)
    except Exception:
        pass
    return 64 * 2**20  # conservative default = v7x (smallest VMEM of the targets)


def _step_bytes(N, C, TL, K, pad, NB, nL, in_item, out_item):
    """Per-grid-step VMEM working set: double-buffered blocks + resident + scratch."""
    x_blk = NB * C * TL * in_item
    o_blk = NB * C * TL * out_item
    w_res = K * 2 * C * max(C, 128) * in_item
    halo_res = min(N * nL * C * 2 * pad * in_item, 8 << 20)
    scratch = NB * C * (TL + 2 * _GUARD) * in_item
    interm = 8 * C * TL * 4            # y + gates + tap slices in flight, all f32
    misc = 2 * C * 128 * 4
    return 2 * (x_blk + o_blk + w_res + halo_res) + scratch + interm + misc


def _choose_tile_l(N, L, C, K, pad, in_item, out_item, budget, max_tl):
    """Largest L-tile that divides L, is a multiple of 128 and fits the VMEM budget."""
    if L % 128 != 0:
        return L                       # single tile along L (block == full array dim)
    best = 128
    t = 128
    while t <= min(L, max_tl):
        if L % t == 0 and _step_bytes(N, C, t, K, pad, 1, L // t,
                                      in_item, out_item) <= budget:
            best = t
        t += 128
    return best


def _choose_nb(N, C, TL, K, pad, nL, in_item, out_item, budget):
    """Pack several batch rows per grid step when C is small (overhead-bound regime)."""
    if C > 32 or N == 1:
        return 1
    best = 1
    for nb in range(2, min(N, 8) + 1):
        if N % nb:
            continue
        if best * C * TL * in_item >= (1 << 20):
            break                      # block already big enough to hide step overhead
        if _step_bytes(N, C, TL, K, pad, nb, nL, in_item, out_item) <= budget:
            best = nb
    return best


def _build_halo(x_in, nL, TL, pad):
    """(N*nL, C, 2*pad): [left | right] boundary columns of every L-tile (zeros at ends)."""
    N, C, _ = x_in.shape
    if nL <= 256:
        # slice-and-stack directly in the target layout: no XLA transpose whose minor
        # dim is only 2..4 elements.
        z = jnp.zeros((N, C, pad), dtype=x_in.dtype)
        tiles = []
        for l in range(nL):
            left = z if l == 0 else x_in[:, :, l * TL - pad:l * TL]
            right = z if l == nL - 1 else x_in[:, :, (l + 1) * TL:(l + 1) * TL + pad]
            tiles.append(jnp.concatenate([left, right], axis=-1))   # (N, C, 2*pad)
        halo = jnp.stack(tiles, axis=1)                             # (N, nL, C, 2*pad)
    else:  # vectorized fallback for very many tiles
        xr = x_in.reshape(N, C, nL, TL)
        z = jnp.zeros((N, C, 1, pad), dtype=x_in.dtype)
        left = jnp.concatenate([z, xr[:, :, :-1, TL - pad:]], axis=2)
        right = jnp.concatenate([xr[:, :, 1:, :pad], z], axis=2)
        halo = jnp.concatenate([left, right], axis=-1).transpose(0, 2, 1, 3)
    return halo.reshape(N * nL, C, 2 * pad)


def highway_conv1d(x, w, b, *, kernel_size=3, dilation=1, tile_l=None,
                   batch_block=None, use_bf16=False):
    """x: (N, C, L); w: (2C, C, K); b: (2C,). Returns (N, C, L)."""
    N, C, L = x.shape
    twoC, Cin, K = w.shape
    assert Cin == C and twoC == 2 * C and K == kernel_size
    # TODO(synk): dilation != 1 not implemented (the tap slices assume stride-1 taps).
    assert dilation == 1, "highway_conv1d Pallas kernel only supports dilation == 1"
    pad = ((K - 1) * dilation + 1) // 2            # PyTorch 'same' padding
    assert pad >= 1, "kernel_size must be >= 2"

    # bf16 casts happen on the HBM side (halves the x / out streams); matmul
    # accumulation, bias and the residual add remain f32 inside the kernel.
    compute_dtype = jnp.bfloat16 if use_bf16 else x.dtype
    x_in = x.astype(compute_dtype)
    w_t = jnp.transpose(w, (2, 0, 1)).astype(compute_dtype)     # (K, 2C, C) per-tap
    b2d = b.reshape(2 * C, 1).astype(jnp.float32)
    out_dtype = compute_dtype
    in_item = jnp.dtype(compute_dtype).itemsize
    out_item = jnp.dtype(out_dtype).itemsize

    # Generation-aware VMEM budgets (v5e/v6e: 128 MiB physical, v7x: 64 MiB).
    vmem_cap = _vmem_capacity_bytes()
    budget = max(16 << 20, int(vmem_cap * 0.375))   # ~24 MiB on v7x, ~48 MiB on v5e/v6e
    max_tl = 8192 if vmem_cap >= (96 << 20) else 2048

    TL = tile_l if tile_l is not None else _choose_tile_l(
        N, L, C, K, pad, in_item, out_item, budget, max_tl)
    assert L % TL == 0 and (TL % 128 == 0 or TL == L) and pad <= TL
    nL = L // TL

    NB = batch_block if batch_block is not None else _choose_nb(
        N, C, TL, K, pad, nL, in_item, out_item, budget)
    assert NB >= 1 and N % NB == 0
    NBlk = N // NB

    has_halo = nL > 1
    halo_bytes = N * nL * C * 2 * pad * in_item
    halo_full = has_halo and (halo_bytes <= (4 << 20) or NBlk == 1)
    # v7x (2 TCs): put the larger / even grid axis first so both cores get work.
    # Never swap if the halo is batch-blocked (it must stay resident across the
    # inner L loop).
    l_first = (NBlk % 2 == 1) and (nL > 1) and (halo_full or not has_halo)

    grid = (nL, NBlk) if l_first else (NBlk, nL)
    l_axis, b_axis = (0, 1) if l_first else (1, 0)

    if l_first:
        x_map = lambda li, bi: (bi, 0, li)
        const3 = lambda li, bi: (0, 0, 0)
        const2 = lambda li, bi: (0, 0)
        halo_map = (lambda li, bi: (0, 0, 0)) if halo_full else (lambda li, bi: (bi, 0, 0))
    else:
        x_map = lambda bi, li: (bi, 0, li)
        const3 = lambda bi, li: (0, 0, 0)
        const2 = lambda bi, li: (0, 0)
        halo_map = (lambda bi, li: (0, 0, 0)) if halo_full else (lambda bi, li: (bi, 0, 0))

    in_specs = [pl.BlockSpec((NB, C, TL), x_map)]
    args = [x_in]
    if has_halo:
        halo = _build_halo(x_in, nL, TL, pad)
        hblk = (N * nL, C, 2 * pad) if halo_full else (NB * nL, C, 2 * pad)
        in_specs.append(pl.BlockSpec(hblk, halo_map))   # resident: no per-step halo DMA
        args.append(halo)
    # constant block indices -> weights / bias stay resident in VMEM
    in_specs += [pl.BlockSpec((K, 2 * C, C), const3),
                 pl.BlockSpec((2 * C, 1), const2)]
    args += [w_t, b2d]

    need = _step_bytes(N, C, TL, K, pad, NB, nL, in_item, out_item)
    vmem_limit = min(max(int(need * 1.25), 16 << 20), int(vmem_cap * 0.75))
    vmem_limit = max(vmem_limit, int(need * 1.05))      # never clamp below actual need
    vmem_limit = min(vmem_limit, vmem_cap - (2 << 20))

    kern = functools.partial(
        highway_kernel, K=K, pad=pad, NB=NB, nL=nL, l_axis=l_axis, b_axis=b_axis,
        has_halo=has_halo, halo_full=halo_full)

    out = pl.pallas_call(
        kern,
        out_shape=jax.ShapeDtypeStruct((N, C, L), out_dtype),
        grid=grid,
        in_specs=in_specs,
        out_specs=pl.BlockSpec((NB, C, TL), x_map),
        scratch_shapes=[pltpu.VMEM((NB, C, TL + 2 * _GUARD), compute_dtype)],
        compiler_params=pltpu.CompilerParams(
            dimension_semantics=("parallel", "parallel"),
            vmem_limit_bytes=int(vmem_limit),
        ),
    )(*args)
    return out


def highway_conv1d_ref(x, w, b, dilation=1):
    """Plain-JAX reference matching PyTorch nn.Conv1d('same') + highway gating."""
    K = w.shape[-1]
    pad = ((K - 1) * dilation + 1) // 2
    y = jax.lax.conv_general_dilated(
        x, w,
        window_strides=(1,),
        padding=[(pad, pad)],
        rhs_dilation=(dilation,),
        dimension_numbers=("NCH", "OIH", "NCH"),
    ) + b[None, :, None]
    y = y[..., : x.shape[-1]]
    C = x.shape[1]
    h1 = jax.nn.sigmoid(y[:, :C, :])
    h2 = jnp.maximum(y[:, C:, :], 0.0)
    return h1 * h2 + (1.0 - h1) * x


if __name__ == "__main__":
    def _run_case(N, C, L, K, tile_l=None, batch_block=None, use_bf16=False, atol=5e-5):
        key = jax.random.PRNGKey(0)
        kx, kw, kb = jax.random.split(key, 3)
        x = jax.random.normal(kx, (N, C, L), dtype=jnp.float32)
        fan_in = C * K
        bound = 1.0 / (fan_in ** 0.5)
        w = jax.random.uniform(kw, (2 * C, C, K), minval=-bound, maxval=bound,
                               dtype=jnp.float32)
        b = jax.random.uniform(kb, (2 * C,), minval=-bound, maxval=bound,
                               dtype=jnp.float32)
        out = jax.block_until_ready(
            highway_conv1d(x, w, b, kernel_size=K, tile_l=tile_l,
                           batch_block=batch_block, use_bf16=use_bf16))
        ref = jax.block_until_ready(highway_conv1d_ref(x, w, b))
        assert out.shape == (N, C, L)
        err = float(jnp.max(jnp.abs(out.astype(jnp.float32) - ref)))
        assert err <= atol, f"max err {err} for N={N} C={C} L={L} K={K} bf16={use_bf16}"

    _run_case(2, 8, 256, 3, tile_l=128)                  # multi-L-tile halo path, NB>1
    _run_case(2, 16, 192, 3)                             # L % 128 != 0 -> whole-L, no halo
    _run_case(1, 8, 256, 5, tile_l=128)                  # wider odd kernel, pad=2 halo
    _run_case(4, 8, 512, 3, tile_l=128)                  # batch-blocked (NB>1), L-axis-first grid
    _run_case(2, 48, 256, 3, tile_l=128)                 # C>32 -> NB=1, NBlk=2, halo resident
    _run_case(2, 8, 256, 3, tile_l=128, use_bf16=True, atol=2e-1)  # bf16 x/w/out streams
    print("KERNEL_OK")
</pallas_src>

<mosaic_0001>
module attributes {stable_mosaic.version = 11 : i64} {
  func.func @highway_kernel(%arg0: i32, %arg1: i32, %arg2: memref<2x8x128xf32, #tpu.memory_space<vmem>>, %arg3: memref<4x8x2xf32, #tpu.memory_space<vmem>>, %arg4: memref<3x16x8xf32, #tpu.memory_space<vmem>>, %arg5: memref<16x1xf32, #tpu.memory_space<vmem>>, %arg6: memref<2x8x128xf32, #tpu.memory_space<vmem>>, %arg7: memref<2x8x384xf32, #tpu.memory_space<vmem>>) attributes {dimension_semantics = [#tpu.dimension_semantics<parallel>, #tpu.dimension_semantics<parallel>], iteration_bounds = array<i64: 2, 1>, scalar_prefetch = 0 : i64, scratch_operands = 1 : i64, tpu.core_type = #tpu.core_type<tc>, window_params = [{transform_indices = @transform_0, window_bounds = array<i64: 2, 8, 128>}, {pipeline_mode = #tpu.pipeline_mode<synchronous>, transform_indices = @transform_1, window_bounds = array<i64: 4, 8, 2>}, {pipeline_mode = #tpu.pipeline_mode<synchronous>, transform_indices = @transform_2, window_bounds = array<i64: 3, 16, 8>}, {pipeline_mode = #tpu.pipeline_mode<synchronous>, transform_indices = @transform_3, window_bounds = array<i64: 16, 1>}, {transform_indices = @transform_4, window_bounds = array<i64: 2, 8, 128>}]} {
    %c0 = arith.constant 0 : index
    %c0_0 = arith.constant 0 : index
    %c0_1 = arith.constant 0 : index
    %0 = vector.load %arg2[%c0, %c0_0, %c0_1] : memref<2x8x128xf32, #tpu.memory_space<vmem>>, vector<1x8x128xf32>
    %1 = vector.shape_cast %0 : vector<1x8x128xf32> to vector<8x128xf32>
    %c0_2 = arith.constant 0 : index
    %c0_3 = arith.constant 0 : index
    %c128 = arith.constant 128 : index
    %2 = vector.load %arg7[%c0_2, %c0_3, %c128] : memref<2x8x384xf32, #tpu.memory_space<vmem>>, vector<1x8x128xf32>
    %3 = vector.shape_cast %2 : vector<1x8x128xf32> to vector<8x128xf32>
    %4 = vector.shape_cast %1 : vector<8x128xf32> to vector<1x8x128xf32>
    tpu.vector_store %arg7[%c0_2, %c0_3, %c128], %4 {strides = array<i32>} : memref<2x8x384xf32, #tpu.memory_space<vmem>>, vector<1x8x128xf32>,
    %c2_i32 = arith.constant 2 : i32
    %5 = arith.muli %arg1, %c2_i32 : i32
    %c0_i32 = arith.constant 0 : i32
    %6 = arith.addi %5, %c0_i32 : i32
    %c2_i32_4 = arith.constant 2 : i32
    %7 = arith.muli %6, %c2_i32_4 : i32
    %8 = arith.addi %7, %arg0 : i32
    %9 = arith.index_cast %8 : i32 to index
    %c0_5 = arith.constant 0 : index
    %c0_6 = arith.constant 0 : index
    %10 = vector.load %arg3[%9, %c0_5, %c0_6] : memref<4x8x2xf32, #tpu.memory_space<vmem>>, vector<1x8x2xf32>
    %11 = vector.shape_cast %10 : vector<1x8x2xf32> to vector<8x2xf32>
    %12 = vector.extract_strided_slice %11 {offsets = [0, 0], sizes = [8, 1], strides = [1, 1]} : vector<8x2xf32> to vector<8x1xf32>
    %c0_7 = arith.constant 0 : index
    %c0_8 = arith.constant 0 : index
    %c127 = arith.constant 127 : index
    %13 = vector.load %arg7[%c0_7, %c0_8, %c127] : memref<2x8x384xf32, #tpu.memory_space<vmem>>, vector<1x8x1xf32>
    %14 = vector.shape_cast %13 : vector<1x8x1xf32> to vector<8x1xf32>
    %15 = vector.shape_cast %12 : vector<8x1xf32> to vector<1x8x1xf32>
    tpu.vector_store %arg7[%c0_7, %c0_8, %c127], %15 {strides = array<i32>} : memref<2x8x384xf32, #tpu.memory_space<vmem>>, vector<1x8x1xf32>,
    %16 = vector.extract_strided_slice %11 {offsets = [0, 1], sizes = [8, 1], strides = [1, 1]} : vector<8x2xf32> to vector<8x1xf32>
    %c0_9 = arith.constant 0 : index
    %c0_10 = arith.constant 0 : index
    %c256 = arith.constant 256 : index
    %17 = vector.load %arg7[%c0_9, %c0_10, %c256] : memref<2x8x384xf32, #tpu.memory_space<vmem>>, vector<1x8x1xf32>
    %18 = vector.shape_cast %17 : vector<1x8x1xf32> to vector<8x1xf32>
    %19 = vector.shape_cast %16 : vector<8x1xf32> to vector<1x8x1xf32>
    tpu.vector_store %arg7[%c0_9, %c0_10, %c256], %19 {strides = array<i32>} : memref<2x8x384xf32, #tpu.memory_space<vmem>>, vector<1x8x1xf32>,
    %c1 = arith.constant 1 : index
    %c0_11 = arith.constant 0 : index
    %c0_12 = arith.constant 0 : index
    %20 = vector.load %arg4[%c1, %c0_11, %c0_12] : memref<3x16x8xf32, #tpu.memory_space<vmem>>, vector<1x16x8xf32>
    %21 = vector.shape_cast %20 : vector<1x16x8xf32> to vector<16x8xf32>
    %cst = arith.constant dense<0.000000e+00> : vector<16x128xf32>
    %22 = tpu.matmul %21, %1, %cst {dimension_numbers = #tpu.dot_dimension_numbers<[1], [0], [0], [1], [0, 0, 1, 1], [], []>} : vector<16x8xf32>, vector<8x128xf32>, vector<16x128xf32> -> vector<16x128xf32>
    %c0_13 = arith.constant 0 : index
    %c0_14 = arith.constant 0 : index
    %c0_15 = arith.constant 0 : index
    %23 = vector.load %arg4[%c0_13, %c0_14, %c0_15] : memref<3x16x8xf32, #tpu.memory_space<vmem>>, vector<1x16x8xf32>
    %24 = vector.shape_cast %23 : vector<1x16x8xf32> to vector<16x8xf32>
    %c0_16 = arith.constant 0 : index
    %c0_17 = arith.constant 0 : index
    %c127_18 = arith.constant 127 : index
    %25 = vector.load %arg7[%c0_16, %c0_17, %c127_18] : memref<2x8x384xf32, #tpu.memory_space<vmem>>, vector<1x8x128xf32>
    %26 = vector.shape_cast %25 : vector<1x8x128xf32> to vector<8x128xf32>
    %cst_19 = arith.constant dense<0.000000e+00> : vector<16x128xf32>
    %27 = tpu.matmul %24, %26, %cst_19 {dimension_numbers = #tpu.dot_dimension_numbers<[1], [0], [0], [1], [0, 0, 1, 1], [], []>} : vector<16x8xf32>, vector<8x128xf32>, vector<16x128xf32> -> vector<16x128xf32>
    %28 = arith.addf %22, %27 : vector<16x128xf32>
    %c2 = arith.constant 2 : index
    %c0_20 = arith.constant 0 : index
    %c0_21 = arith.constant 0 : index
    %29 = vector.load %arg4[%c2, %c0_20, %c0_21] : memref<3x16x8xf32, #tpu.memory_space<vmem>>, vector<1x16x8xf32>
    %30 = vector.shape_cast %29 : vector<1x16x8xf32> to vector<16x8xf32>
    %c0_22 = arith.constant 0 : index
    %c0_23 = arith.constant 0 : index
    %c129 = arith.constant 129 : index
    %31 = vector.load %arg7[%c0_22, %c0_23, %c129] : memref<2x8x384xf32, #tpu.memory_space<vmem>>, vector<1x8x128xf32>
    %32 = vector.shape_cast %31 : vector<1x8x128xf32> to vector<8x128xf32>
    %cst_24 = arith.constant dense<0.000000e+00> : vector<16x128xf32>
    %33 = tpu.matmul %30, %32, %cst_24 {dimension_numbers = #tpu.dot_dimension_numbers<[1], [0], [0], [1], [0, 0, 1, 1], [], []>} : vector<16x8xf32>, vector<8x128xf32>, vector<16x128xf32> -> vector<16x128xf32>
    %34 = arith.addf %28, %33 : vector<16x128xf32>
    %c0_25 = arith.constant 0 : index
    %c0_26 = arith.constant 0 : index
    %35 = vector.load %arg5[%c0_25, %c0_26] : memref<16x1xf32, #tpu.memory_space<vmem>>, vector<16x1xf32>
    %36 = vector.broadcast %35 : vector<16x1xf32> to vector<16x128xf32>
    %37 = arith.addf %34, %36 : vector<16x128xf32>
    %38 = vector.extract_strided_slice %37 {offsets = [0, 0], sizes = [8, 128], strides = [1, 1]} : vector<16x128xf32> to vector<8x128xf32>
    %39 = arith.negf %38 : vector<8x128xf32>
    %40 = math.exp %39 : vector<8x128xf32>
    %cst_27 = arith.constant 1.000000e+00 : f32
    %41 = vector.broadcast %cst_27 : f32 to vector<8x128xf32>
    %42 = arith.addf %41, %40 : vector<8x128xf32>
    %43 = arith.divf %41, %42 : vector<8x128xf32>
    %44 = vector.extract_strided_slice %37 {offsets = [8, 0], sizes = [8, 128], strides = [1, 1]} : vector<16x128xf32> to vector<8x128xf32>
    %cst_28 = arith.constant 0.000000e+00 : f32
    %45 = vector.broadcast %cst_28 : f32 to vector<8x128xf32>
    %46 = arith.maximumf %44, %45 : vector<8x128xf32>
    %47 = arith.mulf %43, %46 : vector<8x128xf32>
    %cst_29 = arith.constant 1.000000e+00 : f32
    %48 = vector.broadcast %cst_29 : f32 to vector<8x128xf32>
    %49 = arith.subf %48, %43 : vector<8x128xf32>
    %50 = arith.mulf %49, %1 : vector<8x128xf32>
    %51 = arith.addf %47, %50 : vector<8x128xf32>
    %c0_30 = arith.constant 0 : index
    %c0_31 = arith.constant 0 : index
    %c0_32 = arith.constant 0 : index
    %52 = vector.load %arg6[%c0_30, %c0_31, %c0_32] : memref<2x8x128xf32, #tpu.memory_space<vmem>>, vector<1x8x128xf32>
    %53 = vector.shape_cast %52 : vector<1x8x128xf32> to vector<8x128xf32>
    %54 = vector.shape_cast %51 : vector<8x128xf32> to vector<1x8x128xf32>
    tpu.vector_store %arg6[%c0_30, %c0_31, %c0_32], %54 {strides = array<i32>} : memref<2x8x128xf32, #tpu.memory_space<vmem>>, vector<1x8x128xf32>,
    %c1_33 = arith.constant 1 : index
    %c0_34 = arith.constant 0 : index
    %c0_35 = arith.constant 0 : index
    %55 = vector.load %arg2[%c1_33, %c0_34, %c0_35] : memref<2x8x128xf32, #tpu.memory_space<vmem>>, vector<1x8x128xf32>
    %56 = vector.shape_cast %55 : vector<1x8x128xf32> to vector<8x128xf32>
    %c1_36 = arith.constant 1 : index
    %c0_37 = arith.constant 0 : index
    %c128_38 = arith.constant 128 : index
    %57 = vector.load %arg7[%c1_36, %c0_37, %c128_38] : memref<2x8x384xf32, #tpu.memory_space<vmem>>, vector<1x8x128xf32>
    %58 = vector.shape_cast %57 : vector<1x8x128xf32> to vector<8x128xf32>
    %59 = vector.shape_cast %56 : vector<8x128xf32> to vector<1x8x128xf32>
    tpu.vector_store %arg7[%c1_36, %c0_37, %c128_38], %59 {strides = array<i32>} : memref<2x8x384xf32, #tpu.memory_space<vmem>>, vector<1x8x128xf32>,
    %c2_i32_39 = arith.constant 2 : i32
    %60 = arith.muli %arg1, %c2_i32_39 : i32
    %c1_i32 = arith.constant 1 : i32
    %61 = arith.addi %60, %c1_i32 : i32
    %c2_i32_40 = arith.constant 2 : i32
    %62 = arith.muli %61, %c2_i32_40 : i32
    %63 = arith.addi %62, %arg0 : i32
    %64 = arith.index_cast %63 : i32 to index
    %c0_41 = arith.constant 0 : index
    %c0_42 = arith.constant 0 : index
    %65 = vector.load %arg3[%64, %c0_41, %c0_42] : memref<4x8x2xf32, #tpu.memory_space<vmem>>, vector<1x8x2xf32>
    %66 = vector.shape_cast %65 : vector<1x8x2xf32> to vector<8x2xf32>
    %67 = vector.extract_strided_slice %66 {offsets = [0, 0], sizes = [8, 1], strides = [1, 1]} : vector<8x2xf32> to vector<8x1xf32>
    %c1_43 = arith.constant 1 : index
    %c0_44 = arith.constant 0 : index
    %c127_45 = arith.constant 127 : index
    %68 = vector.load %arg7[%c1_43, %c0_44, %c127_45] : memref<2x8x384xf32, #tpu.memory_space<vmem>>, vector<1x8x1xf32>
    %69 = vector.shape_cast %68 : vector<1x8x1xf32> to vector<8x1xf32>
    %70 = vector.shape_cast %67 : vector<8x1xf32> to vector<1x8x1xf32>
    tpu.vector_store %arg7[%c1_43, %c0_44, %c127_45], %70 {strides = array<i32>} : memref<2x8x384xf32, #tpu.memory_space<vmem>>, vector<1x8x1xf32>,
    %71 = vector.extract_strided_slice %66 {offsets = [0, 1], sizes = [8, 1], strides = [1, 1]} : vector<8x2xf32> to vector<8x1xf32>
    %c1_46 = arith.constant 1 : index
    %c0_47 = arith.constant 0 : index
    %c256_48 = arith.constant 256 : index
    %72 = vector.load %arg7[%c1_46, %c0_47, %c256_48] : memref<2x8x384xf32, #tpu.memory_space<vmem>>, vector<1x8x1xf32>
    %73 = vector.shape_cast %72 : vector<1x8x1xf32> to vector<8x1xf32>
    %74 = vector.shape_cast %71 : vector<8x1xf32> to vector<1x8x1xf32>
    tpu.vector_store %arg7[%c1_46, %c0_47, %c256_48], %74 {strides = array<i32>} : memref<2x8x384xf32, #tpu.memory_space<vmem>>, vector<1x8x1xf32>,
    %c1_49 = arith.constant 1 : index
    %c0_50 = arith.constant 0 : index
    %c0_51 = arith.constant 0 : index
    %75 = vector.load %arg4[%c1_49, %c0_50, %c0_51] : memref<3x16x8xf32, #tpu.memory_space<vmem>>, vector<1x16x8xf32>
    %76 = vector.shape_cast %75 : vector<1x16x8xf32> to vector<16x8xf32>
    %cst_52 = arith.constant dense<0.000000e+00> : vector<16x128xf32>
    %77 = tpu.matmul %76, %56, %cst_52 {dimension_numbers = #tpu.dot_dimension_numbers<[1], [0], [0], [1], [0, 0, 1, 1], [], []>} : vector<16x8xf32>, vector<8x128xf32>, vector<16x128xf32> -> vector<16x128xf32>
    %c0_53 = arith.constant 0 : index
    %c0_54 = arith.constant 0 : index
    %c0_55 = arith.constant 0 : index
    %78 = vector.load %arg4[%c0_53, %c0_54, %c0_55] : memref<3x16x8xf32, #tpu.memory_space<vmem>>, vector<1x16x8xf32>
    %79 = vector.shape_cast %78 : vector<1x16x8xf32> to vector<16x8xf32>
    %c1_56 = arith.constant 1 : index
    %c0_57 = arith.constant 0 : index
    %c127_58 = arith.constant 127 : index
    %80 = vector.load %arg7[%c1_56, %c0_57, %c127_58] : memref<2x8x384xf32, #tpu.memory_space<vmem>>, vector<1x8x128xf32>
    %81 = vector.shape_cast %80 : vector<1x8x128xf32> to vector<8x128xf32>
    %cst_59 = arith.constant dense<0.000000e+00> : vector<16x128xf32>
    %82 = tpu.matmul %79, %81, %cst_59 {dimension_numbers = #tpu.dot_dimension_numbers<[1], [0], [0], [1], [0, 0, 1, 1], [], []>} : vector<16x8xf32>, vector<8x128xf32>, vector<16x128xf32> -> vector<16x128xf32>
    %83 = arith.addf %77, %82 : vector<16x128xf32>
    %c2_60 = arith.constant 2 : index
    %c0_61 = arith.constant 0 : index
    %c0_62 = arith.constant 0 : index
    %84 = vector.load %arg4[%c2_60, %c0_61, %c0_62] : memref<3x16x8xf32, #tpu.memory_space<vmem>>, vector<1x16x8xf32>
    %85 = vector.shape_cast %84 : vector<1x16x8xf32> to vector<16x8xf32>
    %c1_63 = arith.constant 1 : index
    %c0_64 = arith.constant 0 : index
    %c129_65 = arith.constant 129 : index
    %86 = vector.load %arg7[%c1_63, %c0_64, %c129_65] : memref<2x8x384xf32, #tpu.memory_space<vmem>>, vector<1x8x128xf32>
    %87 = vector.shape_cast %86 : vector<1x8x128xf32> to vector<8x128xf32>
    %cst_66 = arith.constant dense<0.000000e+00> : vector<16x128xf32>
    %88 = tpu.matmul %85, %87, %cst_66 {dimension_numbers = #tpu.dot_dimension_numbers<[1], [0], [0], [1], [0, 0, 1, 1], [], []>} : vector<16x8xf32>, vector<8x128xf32>, vector<16x128xf32> -> vector<16x128xf32>
    %89 = arith.addf %83, %88 : vector<16x128xf32>
    %c0_67 = arith.constant 0 : index
    %c0_68 = arith.constant 0 : index
    %90 = vector.load %arg5[%c0_67, %c0_68] : memref<16x1xf32, #tpu.memory_space<vmem>>, vector<16x1xf32>
    %91 = vector.broadcast %90 : vector<16x1xf32> to vector<16x128xf32>
    %92 = arith.addf %89, %91 : vector<16x128xf32>
    %93 = vector.extract_strided_slice %92 {offsets = [0, 0], sizes = [8, 128], strides = [1, 1]} : vector<16x128xf32> to vector<8x128xf32>
    %94 = arith.negf %93 : vector<8x128xf32>
    %95 = math.exp %94 : vector<8x128xf32>
    %cst_69 = arith.constant 1.000000e+00 : f32
    %96 = vector.broadcast %cst_69 : f32 to vector<8x128xf32>
    %97 = arith.addf %96, %95 : vector<8x128xf32>
    %98 = arith.divf %96, %97 : vector<8x128xf32>
    %99 = vector.extract_strided_slice %92 {offsets = [8, 0], sizes = [8, 128], strides = [1, 1]} : vector<16x128xf32> to vector<8x128xf32>
    %cst_70 = arith.constant 0.000000e+00 : f32
    %100 = vector.broadcast %cst_70 : f32 to vector<8x128xf32>
    %101 = arith.maximumf %99, %100 : vector<8x128xf32>
    %102 = arith.mulf %98, %101 : vector<8x128xf32>
    %cst_71 = arith.constant 1.000000e+00 : f32
    %103 = vector.broadcast %cst_71 : f32 to vector<8x128xf32>
    %104 = arith.subf %103, %98 : vector<8x128xf32>
    %105 = arith.mulf %104, %56 : vector<8x128xf32>
    %106 = arith.addf %102, %105 : vector<8x128xf32>
    %c1_72 = arith.constant 1 : index
    %c0_73 = arith.constant 0 : index
    %c0_74 = arith.constant 0 : index
    %107 = vector.load %arg6[%c1_72, %c0_73, %c0_74] : memref<2x8x128xf32, #tpu.memory_space<vmem>>, vector<1x8x128xf32>
    %108 = vector.shape_cast %107 : vector<1x8x128xf32> to vector<8x128xf32>
    %109 = vector.shape_cast %106 : vector<8x128xf32> to vector<1x8x128xf32>
    tpu.vector_store %arg6[%c1_72, %c0_73, %c0_74], %109 {strides = array<i32>} : memref<2x8x128xf32, #tpu.memory_space<vmem>>, vector<1x8x128xf32>,
    return
  }
  func.func @transform_0(%arg0: i32, %arg1: i32) -> (i32, i32, i32) {
    %c0_i32 = arith.constant 0 : i32
    %c0_i32_0 = arith.constant 0 : i32
    return %arg1, %c0_i32, %arg0 : i32, i32, i32
  }
  func.func @transform_1(%arg0: i32, %arg1: i32) -> (i32, i32, i32) {
    %c0_i32 = arith.constant 0 : i32
    %c0_i32_0 = arith.constant 0 : i32
    %c0_i32_1 = arith.constant 0 : i32
    %c0_i32_2 = arith.constant 0 : i32
    return %c0_i32, %c0_i32_0, %c0_i32_1 : i32, i32, i32
  }
  func.func @transform_2(%arg0: i32, %arg1: i32) -> (i32, i32, i32) {
    %c0_i32 = arith.constant 0 : i32
    %c0_i32_0 = arith.constant 0 : i32
    %c0_i32_1 = arith.constant 0 : i32
    %c0_i32_2 = arith.constant 0 : i32
    return %c0_i32, %c0_i32_0, %c0_i32_1 : i32, i32, i32
  }
  func.func @transform_3(%arg0: i32, %arg1: i32) -> (i32, i32) {
    %c0_i32 = arith.constant 0 : i32
    %c0_i32_0 = arith.constant 0 : i32
    %c0_i32_1 = arith.constant 0 : i32
    return %c0_i32, %c0_i32_0 : i32, i32
  }
  func.func @transform_4(%arg0: i32, %arg1: i32) -> (i32, i32, i32) {
    %c0_i32 = arith.constant 0 : i32
    %c0_i32_0 = arith.constant 0 : i32
    return %arg1, %c0_i32, %arg0 : i32, i32, i32
  }
}

</mosaic_0001>

<bundles_post_ra>
// kernel: tpu_custom_call.1
= control target key start
LH: loop header
LB: loop body
LE: loop exit
PB: predicated region body
PF: predicated region fallthrough
CT: control target
= control target key end

     0   :  { %9 = vsyncpa [#allocation5], 0  ;;  %s1459_s0 = inlined_call_operand.vmem [shape: f32[2,8,256], index: 0, kind: input, shape index: {}]   ;;  %s1460_s1 = inlined_call_operand.vmem [shape: f32[4,8,2], index: 1, kind: input, shape index: {}]   ;;  %s1461_s2 = inlined_call_operand.vmem [shape: f32[3,16,8], index: 2, kind: input, shape index: {}]   ;;  %s1462_s3 = inlined_call_operand.vmem [shape: f32[16,1], index: 3, kind: input, shape index: {}]   ;;  %s1463_s4 = inlined_call_operand.hbm [shape: f32[2,8,256], index: 4, kind: output, shape index: {}]  }
   0x1   :  { %11 = vsyncpa [#allocation5 + $0x1], 0  ;;  %s1262_s15 = smov 0   ;;  %s1264_s16 = smov 0  }
   0x2   :  { %s1266_s17 = smov 0   ;;  %s1268_s18 = smov 0  }
   0x3   :  { %s1270_s19 = smov 0   ;;  %s1272_s20 = smov 0  }
   0x4 LB: > { %s993_s21 = sadd.s32 4294967295, %s1228_s20   ;;  %s994_s22 = sadd.s32 4294967294, %s1228_s20   ;;  %s1228_s20 = sphi %s1272_s20, %s17_s20   ;;  %s1224_s19 = sphi %s1270_s19, %s1470_s19   ;;  %s1220_s18 = sphi %s1268_s18, %s1469_s18   ;;  %s1216_s17 = sphi %s1266_s17, %s1468_s17   ;;  %s1212_s16 = sphi %s1264_s16, %s1467_s16   ;;  %s1208_s15 = sphi %s1262_s15, %s1466_s15  }
   0x5   : > { %s29_s23 = sadd.s32 1, %s1224_s19  ;;  %s38_s24 = sadd.s32 1, %s1216_s17 }
   0x6   : > { %p31_p0 = scmp.ge.s32.totalorder %s29_s23, 2  ;;  %p45_p1 = scmp.ne.s32.totalorder %s1216_s17, %s1212_s16 }
   0x7   : > { %p46_p2 = scmp.eq.s32.totalorder %s1228_s20, 0  ;;  %p140_p3 = scmp.eq.s32.totalorder %s993_s21, 1 }
   0x8   : > { %s1472_s23 = smov (%p31_p0, %s29_s23), 0  ;;  %p145_p6 = scmp.ne.s32.totalorder %s1212_s16, %s1208_s15 }
   0x9   : > { %p47_p4 = por %p46_p2, %p45_p1  ;;  %p1301_p5 = por %p140_p3, %p45_p1 }
   0xa   : > { %s34_s26 = ssub.s32 %s1224_s19, %s1472_s23  ;;  %p146_p8 = scmp.eq.s32.totalorder %s994_s22, 1 }
   0xb   : > { %p36_p7 = scmp.eq.s32.totalorder %s34_s26, 0  ;;  %p996_p10 = scmp.ge.s32.totalorder %s1228_s20, 2 }
   0xc   : > { %p1312_p9 = por %p146_p8, %p145_p6 }
   0xd   : > { %s1310_s27 = scalar_select %p36_p7, %s1216_s17, %s38_s24  }
   0xe   : > { %171 = sbr.rel (%p996_p10) target bundleno = 24 (0x18), region = 28 }
  0x13   : > { %174 = sbr.rel (!%p47_p4) target bundleno = 24 (0x18), region = 32  ;;  %s176_s29 = sand.u32 (%p47_p4), 1, %s1216_s17  }
  0x14   : > { %s998_s30 = sshll.u32 (%p47_p4), %s1224_s19, 3  ;;  %s997_s5 = sshll.u32 (%p47_p4), %s176_s29, 4 }
  0x15   : > { %s183_s8 = scalar_lea.vmem (%p47_p4), %s1459_s0, %s998_s30  ;;  %s178_s9 = scalar_lea.vmem (%p47_p4), [#allocation3], %s997_s5 }
  0x16   : > { %v214_v0 = vld [vmem:[%s183_s8] sm:$0xff] (%p47_p4)  ;;  %v216_v1 = vld [vmem:[%s183_s8 + $0x10] sm:$0xff] (%p47_p4) }
  0x17   : > { %215 = vst [vmem:[%s178_s9] sm:$0xff] (%p47_p4), %v214_v0  ;;  %217 = vst [vmem:[%s178_s9 + $0x8] sm:$0xff] (%p47_p4), %v216_v1 }
  0x18 PF: > { %p999_p11 = scmp.ge.s32.totalorder %s1228_s20, 1  ;;  %p222_p12 = scmp.lt.s32.totalorder %s1228_s20, 3 }
  0x1a   : > { %p223_p13 = pnand %p999_p11, %p222_p12 }
  0x1b   : > { %s1002_s10 = sshll.u32 (!%p223_p13), %s1220_s18, 3  ;;  %s229_s14 = sand.u32 (!%p223_p13), 1, %s1212_s16  }
  0x1c   : > { %226 = sbr.rel (%p223_p13) target bundleno = 539 (0x21b), region = 70  ;;  %s261_s13 = scalar_lea.vmem (!%p223_p13), %s1460_s1, %s1002_s10 }
  0x1d   : > { %s1333_s21 = sshll.u32 (!%p223_p13), %s229_s14, 4  ;;  %s1230_s22 = smov (!%p223_p13), 127  }
  0x1e   : > { %s231_s24 = scalar_lea.vmem (!%p223_p13), [#allocation3], %s1333_s21  ;;  %s1231_s26 = smov (!%p223_p13), 1  }
  0x1f   : > { %s253_s5 = scalar_lea.vmem (!%p223_p13), [#allocation4], %s1333_s21  ;;  %s1030_s7 = sshll.u32 (!%p223_p13), %s1220_s18, 7 }
  0x20   : > { %s903_s6 = sshll.u32 (!%p223_p13), %s253_s5, 4  ;;  %s1409_s10 = scalar_lea.hbm (!%p223_p13), %s1463_s4, %s1030_s7  ;;  %s1403_s6 = int_to_ptr.vmem [resolvable:$true] %s903_s6 }
  0x21   : > { %v262_v2 = vld [vmem:[%s261_s13] sm:$0xff]  ;;  %v1016_v3 = vld [vmem:[%s261_s13 + $0x10] sm:$0xff]  ;;  %v1339_v5 = vld [vmem:[%s231_s24 + $0x8] sm:$0xff]  ;;  %vm286_vm0 = vcmask 64512   ;;  %vm267_vm1 = vcmask 1048568   ;;  %vm269_vm2 = vcmask 7168  }
  0x22   : > { %264 = vrot.lane.b32.xlu0 %v262_v2, %s1230_s22  ;;  %v1337_v4 = vld [vmem:[%s231_s24] sm:$0xff]  ;;  %v1004_v8 = vld [vmem:[%s1461_s2 + $0x18] sm:$0xff]  ;;  %v1232_v14 = vmov 0   ;;  %v547_v17 = vld [vmem:[%s1462_s3 + $0x8] sm:$0xff]  ;;  %vm460_vm3 = vcmask 1039360   ;;  %s1413_s21 = scalar_lea.sflag [#allocation5], %s229_s14 }
  0x23   : > { %282 = vrot.lane.b32.xlu1 %v1337_v4, %s1231_s26  ;;  %1056 = vmatprep.subr.mxu1 %v1337_v4  ;;  %v274_v6 = vld [vmem:[%s1461_s2] sm:$0xff]  ;;  %v1003_v7 = vld [vmem:[%s1461_s2 + $0x10] sm:$0xff]  ;;  %v275_v22 = vld [vmem:[%s1461_s2 + $0x8] sm:$0xff]  ;;  %s1152_s11 = scalar_lea.vmem %s1403_s6, 256  ;;  %s1233_s18 = smov [#allocation4]  }
  0x24   : > { %1057 = vmatpush3.msra.mxu1 %v1337_v4  ;;  %1053 = vmatprep.mubr.msk.f32.mxu0 %vm286_vm0, %v274_v6  ;;  %v860_v16 = vld [vmem:[%s1462_s3] sm:$0xff]  ;;  %v1010_v27 = vld [vmem:[%s1461_s2 + $0x28] sm:$0xff]  ;;  %p1153_p0 = scmp.ne.s32.totalorder %s1403_s6, %s1152_s11  ;;  %s1156_s12 = sshll.u32 %s1233_s18, 4  ;;  %s1157_s12 = int_to_ptr.vmem [resolvable:$false] %s1156_s12 }
  0x25   : > { %1058 = vmatprep.mubr.msk.f32.mxu1 %vm286_vm0, %v1003_v7  ;;  %1143 = vset.pattern.permute.xlu1 %v1232_v14  ;;  %v1009_v23 = vld [vmem:[%s1461_s2 + $0x20] sm:$0xff]  ;;  %s1158_s13 = scalar_lea.vmem %s1157_s12, 512  ;;  %p1159_p3 = scmp.lt.s32.totalorder %s1403_s6, %s1157_s12 }
  0x26   : > { %584 = vrot.lane.b32.xlu0 %v1016_v3, %s1230_s22  ;;  %1059 = vmatmul.mubr.msk.f32.vlgmr.msra.gmra.mxu1 %vm286_vm0, %v1004_v8  ;;  %p1154_p1 = pnand %p1153_p0, %p1301_p5  ;;  %p1160_p4 = scmp.lt.s32.totalorder %s1158_s13, %s1152_s11 }
  0x27   : > { %1068 = vmatprep.mubr.msk.f32.mxu1 %vm286_vm0, %v274_v6  ;;  %1142 = vset.pattern.permute.xlu0 %v1232_v14 }
  0x28   : > { %p1155_p2 = pneg %p1154_p1  ;;  %p1161_p6 = por %p1160_p4, %p1159_p3 }
  0x2a   : > { %456 = vrot.lane.b32.xlu0 %v1337_v4, %s1230_s22  ;;  %p1162_p7 = pnand %p1161_p6, %p1155_p2 }
  0x94   : > { %v265_v9 = vpop.permute.xlu0 %264 }
  0x95   : > { %268 = vst.msk [vmem:[#allocation2] sm:$0xff] %vm267_vm1, %v265_v9  ;;  %v283_v18 = vpop.permute.xlu1 %282 }
  0x96   : > { %270 = vst.msk [vmem:[#allocation2 + $0x10] sm:$0xff] %vm269_vm2, %v265_v9 }
  0x98   : > { %v585_v10 = vpop.permute.xlu0 %584 }
  0x99   : > { %587 = vst.msk [vmem:[#allocation2 + $0x18] sm:$0xff] %vm267_vm1, %v585_v10 }
  0x9a   : > { %588 = vst.msk [vmem:[#allocation2 + $0x28] sm:$0xff] %vm269_vm2, %v585_v10 }
  0x9c   : > { %v276_v11 = vld [vmem:[#allocation2] sm:$0xff]  ;;  %v457_v19 = vpop.permute.xlu0 %456 }
  0x9d   : > { %280 = vrot.lane.b32.xlu1 %v276_v11, %s1231_s26  ;;  %v453_v12 = vld [vmem:[#allocation2 + $0x10] sm:$0xff] }
  0xa0   : > { %v593_v13 = vld [vmem:[#allocation2 + $0x18] sm:$0xff] }
  0xa1   : > { %458 = vrot.lane.b32.xlu1 %v453_v12, %s1230_s22  ;;  %597 = vrot.lane.b32.xlu0 %v593_v13, %s1231_s26  ;;  %v768_v15 = vld [vmem:[#allocation2 + $0x28] sm:$0xff] }
  0xa5   : > { %599 = vrot.lane.b32.xlu1 %v1339_v5, %s1231_s26  ;;  %771 = vrot.lane.b32.xlu0 %v1339_v5, %s1230_s22 }
  0xa9   : > { %773 = vrot.lane.b32.xlu1 %v768_v15, %s1230_s22  ;;  %550 = vperm.xlu0 %1142, %v860_v16  }
  0xad   : > { %864 = vperm.xlu1 %1143, %v860_v16   ;;  %869 = vperm.xlu0 %1142, %v547_v17  }
  0xb1   : > { %555 = vperm.xlu1 %1143, %v547_v17  }
  0xe6   : > { %v1060_v33 = vpop.f32.mrf.mxu1 }
  0xe8   : > { %v440_v36 = vpop.f32.mrf.mxu1 }
 0x10f   : > { %v281_v20 = vpop.permute.xlu1 %280 }
 0x110   : > { %v284_v21 = vsel %vm269_vm2, %v281_v20, %v283_v18 }
 0x111   : > { %1051 = vmatprep.subr.mxu0 %v284_v21 }
 0x112   : > { %1052 = vmatpush3.msra.mxu0 %v284_v21 }
 0x113   : > { %1054 = vmatmul.mubr.msk.f32.vlgmr.msra.gmra.mxu0 %vm286_vm0, %v275_v22  ;;  %v459_v24 = vpop.permute.xlu1 %458  ;;  %v598_v25 = vpop.permute.xlu0 %597 }
 0x114   : > { %v461_v26 = vsel %vm460_vm3, %v457_v19, %v459_v24  ;;  %1063 = vmatprep.mubr.msk.f32.mxu0 %vm286_vm0, %v1009_v23 }
 0x115   : > { %1061 = vmatprep.subr.mxu0 %v461_v26 }
 0x116   : > { %1062 = vmatpush3.msra.mxu0 %v461_v26 }
 0x117   : > { %1064 = vmatmul.mubr.msk.f32.vlgmr.msra.gmra.mxu0 %vm286_vm0, %v1010_v27  ;;  %v600_v28 = vpop.permute.xlu1 %599  ;;  %1071 = vmatprep.subr.mxu0 %v1339_v5  ;;  %v772_v30 = vpop.permute.xlu0 %771 }
 0x118   : > { %v601_v29 = vsel %vm269_vm2, %v598_v25, %v600_v28  ;;  %1072 = vmatpush3.msra.mxu0 %v1339_v5  ;;  %1073 = vmatprep.mubr.msk.f32.mxu0 %vm286_vm0, %v1003_v7 }
 0x119   : > { %1066 = vmatprep.subr.mxu1 %v601_v29 }
 0x11a   : > { %1067 = vmatpush3.msra.mxu1 %v601_v29 }
 0x11b   : > { %1069 = vmatmul.mubr.msk.f32.vlgmr.msra.gmra.mxu1 %vm286_vm0, %v275_v22  ;;  %v774_v31 = vpop.permute.xlu1 %773  ;;  %1074 = vmatmul.mubr.msk.f32.vlgmr.msra.gmra.mxu0 %vm286_vm0, %v1004_v8 }
 0x11c   : > { %v775_v32 = vsel %vm460_vm3, %v772_v30, %v774_v31  ;;  %1078 = vmatprep.mubr.msk.f32.mxu1 %vm286_vm0, %v1009_v23 }
 0x11d   : > { %1076 = vmatprep.subr.mxu1 %v775_v32 }
 0x11e   : > { %1077 = vmatpush3.msra.mxu1 %v775_v32 }
 0x11f   : > { %1079 = vmatmul.mubr.msk.f32.vlgmr.msra.gmra.mxu1 %vm286_vm0, %v1010_v27 }
 0x124   : > { %v551_v40 = vpop.permute.xlu0 %550 }
 0x128   : > { %v865_v52 = vpop.permute.xlu1 %864  ;;  %v870_v6 = vpop.permute.xlu0 %869 }
 0x12c   : > { %v556_v61 = vpop.permute.xlu1 %555 }
 0x1d3   : > { %v1055_v34 = vpop.f32.mrf.mxu0 }
 0x1d4   : > { %v446_v57 = vadd.f32 %v1060_v33, %v1055_v34 }
 0x1d5   : > { %v359_v35 = vpop.f32.mrf.mxu0 }
 0x1d6   : > { %v441_v38 = vadd.f32 %v440_v36, %v359_v35 }
 0x1d7   : > { %v1065_v37 = vpop.f32.mrf.mxu0 }
 0x1d8   : > { %v545_v59 = vadd.f32 %v1065_v37, %v446_v57 }
 0x1d9   : > { %v535_v39 = vpop.f32.mrf.mxu0 }
 0x1da   : > { %v544_v41 = vadd.f32 %v535_v39, %v441_v38  ;;  %v559_v62 = vadd.f32 %v556_v61, %v545_v59 }
 0x1db   : > { %v1070_v42 = vpop.f32.mrf.mxu1  ;;  %v1075_v43 = vpop.f32.mrf.mxu0 }
 0x1dc   : > { %v558_v44 = vadd.f32 %v551_v40, %v544_v41  ;;  %v762_v63 = vadd.f32 %v1075_v43, %v1070_v42  ;;  %v566_v2 = vmax.f32 %v559_v62, 0.0 }
 0x1dd   : > { %v675_v45 = vpop.f32.mrf.mxu1  ;;  %v756_v46 = vpop.f32.mrf.mxu0 }
 0x1de   : > { %v1013_v47 = vmul.f32 -1.442695, %v558_v44  ;;  %v757_v49 = vadd.f32 %v756_v46, %v675_v45 }
 0x1df   : > { %v1080_v48 = vpop.f32.mrf.mxu1 }
 0x1e0   : > { %1144 = vpow2.f32 %v1013_v47  ;;  %v859_v3 = vadd.f32 %v1080_v48, %v762_v63 }
 0x1e1   : > { %v849_v50 = vpop.f32.mrf.mxu1 }
 0x1e2   : > { %v858_v51 = vadd.f32 %v849_v50, %v757_v49  ;;  %v873_v10 = vadd.f32 %v870_v6, %v859_v3 }
 0x1e4   : > { %v872_v53 = vadd.f32 %v865_v52, %v858_v51  ;;  %v880_v12 = vmax.f32 %v873_v10, 0.0 }
 0x1e6   : > { %v1027_v54 = vmul.f32 -1.442695, %v872_v53 }
 0x1e8   : > { %1146 = vpow2.f32 %v1027_v54 }
 0x1ed   : > { %v1145_v55 = vpop.eup %1144 }
 0x1ee   : > { %v563_v56 = vadd.f32 1.0, %v1145_v55 }
 0x1f0   : > { %1148 = vrcp.f32 %v563_v56 }
 0x1f5   : > { %v1147_v58 = vpop.eup %1146 }
 0x1f6   : > { %v877_v60 = vadd.f32 1.0, %v1147_v58 }
 0x1f8   : > { %1150 = vrcp.f32 %v877_v60 }
 0x1fd   : > { %v1149_v0 = vpop.eup %1148 }
 0x1fe   : > { %v568_v1 = vsub.f32 1.0, %v1149_v0  ;;  %v567_v8 = vmul.f32 %v1149_v0, %v566_v2 }
 0x200   : > { %v569_v7 = vmul.f32 %v568_v1, %v1337_v4 }
 0x202   : > { %v570_v9 = vadd.f32 %v569_v7, %v567_v8 }
 0x204   : > { %571 = vst [vmem:[%s253_s5] sm:$0xff] %v570_v9 }
 0x205   : > { %v1151_v11 = vpop.eup %1150 }
 0x206   : > { %v882_v13 = vsub.f32 1.0, %v1151_v11  ;;  %v881_v14 = vmul.f32 %v1151_v11, %v880_v12 }
 0x208   : > { %v883_v4 = vmul.f32 %v1339_v5, %v882_v13 }
 0x20a   : > { %v884_v15 = vadd.f32 %v883_v4, %v881_v14 }
 0x20c   : > { %1028 = vst [vmem:[%s253_s5 + $0x8] sm:$0xff] %v884_v15 }
 0x20d   : > { %1165 = shalt.err (!%p1162_p7)
}
 0x20e   : > { %s1166_s14 = scalar_lea.hbm %s1409_s10, 256  ;;  %s1170_s26 = scalar_lea.hbm %s1463_s4, 512 }
 0x20f   : > { %p1167_p8 = scmp.ne.s32.totalorder %s1409_s10, %s1166_s14  ;;  %p1171_p13 = scmp.lt.s32.totalorder %s1409_s10, %s1463_s4 }
 0x210   : > { %p1172_p0 = scmp.lt.s32.totalorder %s1170_s26, %s1166_s14 }
 0x211   : > { %p1168_p11 = pnand %p1167_p8, %p1301_p5 }
 0x212   : > { %p1173_p1 = por %p1172_p0, %p1171_p13 }
 0x213   : > { %p1169_p12 = pneg %p1168_p11 }
 0x215   : > { %p1174_p2 = pnand %p1173_p1, %p1169_p12 }
 0x217   : > { %1177 = shalt.err (!%p1174_p2)
}
 0x218   : > { %s1234_s5 = smov 128   ;;  %s1235_s7 = smov 256  }
 0x219   : > { %s1236_s8 = smov 8  }
 0x21a   : > { %1081 = dma.vmem_to_hbm [thread:$0]  (%p1301_p5), %s1403_s6, 256, %s1409_s10, %s1413_s21, %s1234_s5, %s1235_s7, %s1236_s8  }
 0x21b PF: > { %s918_s9 = sand.u32 1, %s1208_s15   ;;  %p1084_p3 = pnand %p996_p10, %p1312_p9 }
 0x21c   : > { %s919_s11 = scalar_lea.sflag [#allocation5], %s918_s9 }
 0x21d   : > { %p1085_p4 = pneg %p1084_p3 }
 0x21f   : > { %1203 = dma.done.wait (%p1085_p4), %s919_s11, 256  }
 0x220   : > { %1205 = vsyncadd (%p1085_p4), %s919_s11, 4294967040  ;;  %s17_s20 = sadd.s32 1, %s1228_s20   ;;  %s1466_s15 = smov %s1212_s16 }
 0x221   : > { %p14_p6 = scmp.ge.s32.totalorder %s17_s20, 4   ;;  %s1467_s16 = smov %s1216_s17 }
 0x222   : > { %s1468_s17 = smov %s1310_s27  ;;  %s1469_s18 = smov %s1224_s19 }
 0x223   : > { %s1470_s19 = smov %s1472_s23  ;;  %16 = sbr.rel (!%p14_p6) target bundleno = 4 (0x4), region = 121 }
 0x228   :  { %924 = vsyncpa [#allocation5], 1 }
 0x229   :  { %926 = vsyncpa [#allocation5 + $0x1], 1 }

</bundles_post_ra>
